<compile_context>
chip_gen: v5e
topology: v5e:2x2
jax: 0.10.0
libtpu: 0.0.40
codegen_flags: <defaults>
</compile_context>

<pallas_src>
import functools

import jax
import jax.numpy as jnp
from jax.experimental import pallas as pl
from jax.experimental.pallas import tpu as pltpu


def _round_up(x: int, m: int) -> int:
    return (x + m - 1) // m * m


def _vmem_capacity_bytes() -> int:
    try:
        return int(pltpu.get_tpu_info().vmem_capacity_bytes)
    except Exception:
        return 64 << 20  # conservative (v7x per-TC VMEM)


def _mlp_kernel(x_ref, w1_ref, b1_ref, w2_ref, b2_ref, w3_ref, b3_ref, o_ref):
    """Fused 3-layer MLP on one batch tile (bf16 MXU operands, f32 accumulation)."""
    cdt = w1_ref.dtype                                  # compute dtype (bf16)
    x = x_ref[...].astype(cdt)                          # f32 -> bf16 in-kernel

    h1 = jnp.dot(x, w1_ref[...], preferred_element_type=jnp.float32)
    h1 = jnp.maximum(h1 + b1_ref[...], 0.0).astype(cdt)

    h2 = jnp.dot(h1, w2_ref[...], preferred_element_type=jnp.float32)
    h2 = jnp.maximum(h2 + b2_ref[...], 0.0).astype(cdt)

    out = jnp.dot(h2, w3_ref[...], preferred_element_type=jnp.float32)
    o_ref[...] = (out + b3_ref[...]).astype(o_ref.dtype)


def init_latent_encoder_params(key, input_dim, latent_dim, hidden_dims):
    """PyTorch-default-style init: U(-1/sqrt(fan_in), +). Stored as (in, out) == weight.T."""
    dims = [input_dim] + list(hidden_dims) + [latent_dim]
    params = {}
    for idx, (din, dout) in enumerate(zip(dims[:-1], dims[1:]), start=1):
        key, kw, kb = jax.random.split(key, 3)
        bound = 1.0 / (din ** 0.5)
        params[f"w{idx}"] = jax.random.uniform(
            kw, (din, dout), jnp.float32, minval=-bound, maxval=bound)
        params[f"b{idx}"] = jax.random.uniform(
            kb, (1, dout), jnp.float32, minval=-bound, maxval=bound)
    return params


def prepare_params(params, compute_dtype=jnp.bfloat16):
    """Weights -> bf16, biases stay f32.

    Only *hidden* feature dims are zero-padded to a multiple of 128 (lane-dense
    resident intermediates); the input dim and the latent (output) dim stay
    unpadded so the streamed x read and the output writeback carry no dead bytes.
    Zero padding is inert: padded h columns are ReLU(0+0)=0 and hit zero weight rows.
    """
    n_layers = len([k for k in params if k.startswith("w")])
    prepped = {}
    for idx in range(1, n_layers + 1):
        w = params[f"w{idx}"]
        b = params[f"b{idx}"]
        din, dout = w.shape
        din_p = din if idx == 1 else _round_up(din, 128)
        dout_p = dout if idx == n_layers else _round_up(dout, 128)
        w_p = jnp.zeros((din_p, dout_p), compute_dtype)
        w_p = w_p.at[:din, :dout].set(w.astype(compute_dtype))
        b_p = jnp.zeros((1, dout_p), jnp.float32).at[:, :dout].set(b.astype(jnp.float32))
        prepped[f"w{idx}"] = w_p
        prepped[f"b{idx}"] = b_p
    return prepped


def latent_encoder_forward(x, prepped, *, latent_dim, batch_tile=2048, min_grid_steps=4,
                           out_dtype=jnp.float32, single_buffer_weights=False,
                           vmem_limit_bytes=None):
    """Pallas forward for LatentEncoder.

    x:        (B, input_dim) float32 (any B; ragged last tile handled by Pallas)
    prepped:  output of prepare_params (bf16 weights, f32 biases)
    """
    B, Din = x.shape
    w1, b1 = prepped["w1"], prepped["b1"]
    w2, b2 = prepped["w2"], prepped["b2"]
    w3, b3 = prepped["w3"], prepped["b3"]
    assert w1.shape[0] == Din, (w1.shape, Din)
    assert w1.shape[1] == w2.shape[0] and w2.shape[1] == w3.shape[0]
    assert w3.shape[1] == latent_dim, (w3.shape, latent_dim)
    H1p, H2p = w1.shape[1], w2.shape[1]
    xbytes = jnp.dtype(x.dtype).itemsize
    obytes = jnp.dtype(out_dtype).itemsize

    # --- batch tiling -------------------------------------------------------
    B8 = _round_up(B, 8)
    bt = max(8, min(_round_up(int(batch_tile), 8), B8))
    if min_grid_steps > 1:
        # Keep >= min_grid_steps grid steps so the "parallel" batch axis can feed
        # both v7x TensorCores (costs only ~0.35us/extra step on 1-TC v5e/v6e).
        bt = min(bt, max(8, _round_up(pl.cdiv(B8, int(min_grid_steps)), 8)))
    grid = (pl.cdiv(B, bt),)

    # --- cost estimate for the XLA scheduler --------------------------------
    wbytes = sum(int(p.size) * p.dtype.itemsize for p in (w1, b1, w2, b2, w3, b3))
    flops = 2 * B * (Din * H1p + H1p * H2p + H2p * latent_dim)
    bytes_accessed = B * Din * xbytes + wbytes + B * latent_dim * obytes

    # --- VMEM budget (generation-aware clamp) -------------------------------
    if vmem_limit_bytes is None:
        wmult = 1 if single_buffer_weights else 2
        need = (wmult * wbytes
                + 2 * bt * Din * xbytes            # double-buffered x tiles
                + 2 * bt * latent_dim * obytes     # double-buffered output tiles
                + bt * (H1p + H2p) * 4             # f32 intermediates (VMEM spill)
                + (4 << 20))                       # headroom
        vmem_limit_bytes = int(min(max(need, 16 << 20),
                                   int(0.9 * _vmem_capacity_bytes())))

    # Grid-invariant operands (constant index_map); optionally single-buffered
    # to halve resident-weight VMEM on v7x when hidden dims scale up.
    def _resident(shape):
        if single_buffer_weights:
            return pl.BlockSpec(shape, lambda i: (0, 0), pipeline_mode=pl.Buffered(1))
        return pl.BlockSpec(shape, lambda i: (0, 0))

    return pl.pallas_call(
        _mlp_kernel,
        out_shape=jax.ShapeDtypeStruct((B, latent_dim), out_dtype),
        grid=grid,
        in_specs=[
            pl.BlockSpec((bt, Din), lambda i: (i, 0)),   # streamed batch tile (unpadded)
            _resident(w1.shape), _resident(b1.shape),
            _resident(w2.shape), _resident(b2.shape),
            _resident(w3.shape), _resident(b3.shape),
        ],
        out_specs=pl.BlockSpec((bt, latent_dim), lambda i: (i, 0)),  # unpadded latent slab
        compiler_params=pltpu.CompilerParams(
            dimension_semantics=("parallel",),
            vmem_limit_bytes=int(vmem_limit_bytes),
        ),
        cost_estimate=pl.CostEstimate(
            flops=int(flops), transcendentals=0, bytes_accessed=int(bytes_accessed)),
    )(x, w1, b1, w2, b2, w3, b3)


def _reference_bf16(x, params):
    """Pure-JAX reference of exactly what the kernel computes (bf16 operands, f32 accum)."""
    cdt = jnp.bfloat16
    h = x.astype(cdt)
    for i in (1, 2):
        h = jnp.dot(h, params[f"w{i}"].astype(cdt), preferred_element_type=jnp.float32)
        h = jnp.maximum(h + params[f"b{i}"], 0.0).astype(cdt)
    out = jnp.dot(h, params["w3"].astype(cdt), preferred_element_type=jnp.float32)
    return out + params["b3"]


def _reference_f32(x, params):
    h = jnp.maximum(x @ params["w1"] + params["b1"], 0.0)
    h = jnp.maximum(h @ params["w2"] + params["b2"], 0.0)
    return h @ params["w3"] + params["b3"]


if __name__ == "__main__":
    # Small shapes consistent with the module (default hidden_dims=[256, 512]).
    batch = 32
    input_dim = 32
    latent_dim = 16
    hidden_dims = [256, 512]

    key = jax.random.PRNGKey(0)
    key, kx = jax.random.split(key)
    x = jax.random.normal(kx, (batch, input_dim), dtype=jnp.float32)

    params = init_latent_encoder_params(key, input_dim, latent_dim, hidden_dims)
    prepped = prepare_params(params)

    # Defaults: batch_tile=2048 is capped by min_grid_steps=4 -> bt=8, 4 grid steps,
    # which exercises the pipelined multi-step path even at this tiny batch.
    fwd = jax.jit(functools.partial(latent_encoder_forward, latent_dim=latent_dim))

    out = jax.block_until_ready(fwd(x, prepped))
    assert out.shape == (batch, latent_dim), out.shape

    ref_bf16 = _reference_bf16(x, params)
    ref_f32 = _reference_f32(x, params)
    assert jnp.allclose(out, ref_bf16, atol=1e-2, rtol=1e-2), "mismatch vs bf16 reference"
    assert jnp.allclose(out, ref_f32, atol=5e-2, rtol=5e-2), "mismatch vs f32 reference"

    print("KERNEL_OK")
</pallas_src>

<mosaic_0001>
module attributes {stable_mosaic.version = 11 : i64} {
  func.func @_mlp_kernel(%arg0: i32, %arg1: memref<8x32xf32, #tpu.memory_space<vmem>>, %arg2: memref<32x256xbf16, #tpu.memory_space<vmem>>, %arg3: memref<1x256xf32, #tpu.memory_space<vmem>>, %arg4: memref<256x512xbf16, #tpu.memory_space<vmem>>, %arg5: memref<1x512xf32, #tpu.memory_space<vmem>>, %arg6: memref<512x16xbf16, #tpu.memory_space<vmem>>, %arg7: memref<1x16xf32, #tpu.memory_space<vmem>>, %arg8: memref<8x16xf32, #tpu.memory_space<vmem>>) attributes {dimension_semantics = [#tpu.dimension_semantics<parallel>], iteration_bounds = array<i64: 4>, scalar_prefetch = 0 : i64, scratch_operands = 0 : i64, tpu.core_type = #tpu.core_type<tc>, window_params = [{transform_indices = @transform_0, window_bounds = array<i64: 8, 32>}, {pipeline_mode = #tpu.pipeline_mode<synchronous>, transform_indices = @transform_1, window_bounds = array<i64: 32, 256>}, {pipeline_mode = #tpu.pipeline_mode<synchronous>, transform_indices = @transform_2, window_bounds = array<i64: 1, 256>}, {pipeline_mode = #tpu.pipeline_mode<synchronous>, transform_indices = @transform_3, window_bounds = array<i64: 256, 512>}, {pipeline_mode = #tpu.pipeline_mode<synchronous>, transform_indices = @transform_4, window_bounds = array<i64: 1, 512>}, {pipeline_mode = #tpu.pipeline_mode<synchronous>, transform_indices = @transform_5, window_bounds = array<i64: 512, 16>}, {pipeline_mode = #tpu.pipeline_mode<synchronous>, transform_indices = @transform_6, window_bounds = array<i64: 1, 16>}, {transform_indices = @transform_7, window_bounds = array<i64: 8, 16>}]} {
    %c0 = arith.constant 0 : index
    %c0_0 = arith.constant 0 : index
    %0 = vector.load %arg1[%c0, %c0_0] : memref<8x32xf32, #tpu.memory_space<vmem>>, vector<8x32xf32>
    %1 = arith.truncf %0 : vector<8x32xf32> to vector<8x32xbf16>
    %c0_1 = arith.constant 0 : index
    %c0_2 = arith.constant 0 : index
    %2 = vector.load %arg2[%c0_1, %c0_2] : memref<32x256xbf16, #tpu.memory_space<vmem>>, vector<32x256xbf16>
    %cst = arith.constant dense<0.000000e+00> : vector<8x256xf32>
    %3 = tpu.matmul %1, %2, %cst {dimension_numbers = #tpu.dot_dimension_numbers<[1], [0], [0], [1], [0, 0, 1, 1], [], []>} : vector<8x32xbf16>, vector<32x256xbf16>, vector<8x256xf32> -> vector<8x256xf32>
    %c0_3 = arith.constant 0 : index
    %c0_4 = arith.constant 0 : index
    %4 = vector.load %arg3[%c0_3, %c0_4] : memref<1x256xf32, #tpu.memory_space<vmem>>, vector<1x256xf32>
    %5 = vector.broadcast %4 : vector<1x256xf32> to vector<8x256xf32>
    %6 = arith.addf %3, %5 : vector<8x256xf32>
    %cst_5 = arith.constant 0.000000e+00 : f32
    %7 = vector.broadcast %cst_5 : f32 to vector<8x256xf32>
    %8 = arith.maximumf %6, %7 : vector<8x256xf32>
    %9 = arith.truncf %8 : vector<8x256xf32> to vector<8x256xbf16>
    %c0_6 = arith.constant 0 : index
    %c0_7 = arith.constant 0 : index
    %10 = vector.load %arg4[%c0_6, %c0_7] : memref<256x512xbf16, #tpu.memory_space<vmem>>, vector<256x512xbf16>
    %cst_8 = arith.constant dense<0.000000e+00> : vector<8x512xf32>
    %11 = tpu.matmul %9, %10, %cst_8 {dimension_numbers = #tpu.dot_dimension_numbers<[1], [0], [0], [1], [0, 0, 1, 1], [], []>} : vector<8x256xbf16>, vector<256x512xbf16>, vector<8x512xf32> -> vector<8x512xf32>
    %c0_9 = arith.constant 0 : index
    %c0_10 = arith.constant 0 : index
    %12 = vector.load %arg5[%c0_9, %c0_10] : memref<1x512xf32, #tpu.memory_space<vmem>>, vector<1x512xf32>
    %13 = vector.broadcast %12 : vector<1x512xf32> to vector<8x512xf32>
    %14 = arith.addf %11, %13 : vector<8x512xf32>
    %cst_11 = arith.constant 0.000000e+00 : f32
    %15 = vector.broadcast %cst_11 : f32 to vector<8x512xf32>
    %16 = arith.maximumf %14, %15 : vector<8x512xf32>
    %17 = arith.truncf %16 : vector<8x512xf32> to vector<8x512xbf16>
    %c0_12 = arith.constant 0 : index
    %c0_13 = arith.constant 0 : index
    %18 = vector.load %arg6[%c0_12, %c0_13] : memref<512x16xbf16, #tpu.memory_space<vmem>>, vector<512x16xbf16>
    %cst_14 = arith.constant dense<0.000000e+00> : vector<8x16xf32>
    %19 = tpu.matmul %17, %18, %cst_14 {dimension_numbers = #tpu.dot_dimension_numbers<[1], [0], [0], [1], [0, 0, 1, 1], [], []>} : vector<8x512xbf16>, vector<512x16xbf16>, vector<8x16xf32> -> vector<8x16xf32>
    %c0_15 = arith.constant 0 : index
    %c0_16 = arith.constant 0 : index
    %20 = vector.load %arg7[%c0_15, %c0_16] : memref<1x16xf32, #tpu.memory_space<vmem>>, vector<1x16xf32>
    %21 = vector.broadcast %20 : vector<1x16xf32> to vector<8x16xf32>
    %22 = arith.addf %19, %21 : vector<8x16xf32>
    %c0_17 = arith.constant 0 : index
    %c0_18 = arith.constant 0 : index
    %23 = vector.load %arg8[%c0_17, %c0_18] : memref<8x16xf32, #tpu.memory_space<vmem>>, vector<8x16xf32>
    tpu.vector_store %arg8[%c0_17, %c0_18], %22 {strides = array<i32>} : memref<8x16xf32, #tpu.memory_space<vmem>>, vector<8x16xf32>,
    return
  }
  func.func @transform_0(%arg0: i32) -> (i32, i32) {
    %c0_i32 = arith.constant 0 : i32
    %c0_i32_0 = arith.constant 0 : i32
    return %arg0, %c0_i32 : i32, i32
  }
  func.func @transform_1(%arg0: i32) -> (i32, i32) {
    %c0_i32 = arith.constant 0 : i32
    %c0_i32_0 = arith.constant 0 : i32
    %c0_i32_1 = arith.constant 0 : i32
    return %c0_i32, %c0_i32_0 : i32, i32
  }
  func.func @transform_2(%arg0: i32) -> (i32, i32) {
    %c0_i32 = arith.constant 0 : i32
    %c0_i32_0 = arith.constant 0 : i32
    %c0_i32_1 = arith.constant 0 : i32
    return %c0_i32, %c0_i32_0 : i32, i32
  }
  func.func @transform_3(%arg0: i32) -> (i32, i32) {
    %c0_i32 = arith.constant 0 : i32
    %c0_i32_0 = arith.constant 0 : i32
    %c0_i32_1 = arith.constant 0 : i32
    return %c0_i32, %c0_i32_0 : i32, i32
  }
  func.func @transform_4(%arg0: i32) -> (i32, i32) {
    %c0_i32 = arith.constant 0 : i32
    %c0_i32_0 = arith.constant 0 : i32
    %c0_i32_1 = arith.constant 0 : i32
    return %c0_i32, %c0_i32_0 : i32, i32
  }
  func.func @transform_5(%arg0: i32) -> (i32, i32) {
    %c0_i32 = arith.constant 0 : i32
    %c0_i32_0 = arith.constant 0 : i32
    %c0_i32_1 = arith.constant 0 : i32
    return %c0_i32, %c0_i32_0 : i32, i32
  }
  func.func @transform_6(%arg0: i32) -> (i32, i32) {
    %c0_i32 = arith.constant 0 : i32
    %c0_i32_0 = arith.constant 0 : i32
    %c0_i32_1 = arith.constant 0 : i32
    return %c0_i32, %c0_i32_0 : i32, i32
  }
  func.func @transform_7(%arg0: i32) -> (i32, i32) {
    %c0_i32 = arith.constant 0 : i32
    %c0_i32_0 = arith.constant 0 : i32
    return %arg0, %c0_i32 : i32, i32
  }
}

</mosaic_0001>

<bundles_post_ra>
// kernel: latent_encoder_forward.1
= control target key start
LH: loop header
LB: loop body
LE: loop exit
PB: predicated region body
PF: predicated region fallthrough
CT: control target
= control target key end

     0   :  { %12 = vsyncpa [#allocation3], 0  ;;  %s1863_s24 = smov 0   ;;  %s2021_s0 = inlined_call_operand.vmem [shape: f32[32,32], index: 0, kind: input, shape index: {}]   ;;  %s2022_s1 = inlined_call_operand.vmem [shape: bf16[32,256], index: 1, kind: input, shape index: {}]   ;;  %s2023_s2 = inlined_call_operand.vmem [shape: f32[1,256], index: 2, kind: input, shape index: {}]   ;;  %s2024_s3 = inlined_call_operand.hbm [shape: bf16[256,512], index: 3, kind: input, shape index: {}]   ;;  %s2025_s4 = inlined_call_operand.vmem [shape: f32[1,512], index: 4, kind: input, shape index: {}]   ;;  %s2026_s5 = inlined_call_operand.vmem [shape: bf16[512,16], index: 5, kind: input, shape index: {}]   ;;  %s2027_s6 = inlined_call_operand.vmem [shape: f32[1,16], index: 6, kind: input, shape index: {}]   ;;  %s2028_s7 = inlined_call_operand.vmem [shape: f32[32,16], index: 7, kind: output, shape index: {}]  }
   0x1 LB: > { %s218_s27 = sshll.u32 %s2024_s3, 4  ;;  %s1243_s28 = sadd.s32 4294967295, %s1818_s24   ;;  %s1818_s24 = sphi %s1863_s24, %s18_s24   ;;  %s219_s27 = int_to_ptr.hbm [resolvable:$true] %s218_s27 }
   0x2   : > { %p1245_p0 = scmp.ge.s32.totalorder %s1818_s24, 1  ;;  %p201_p1 = scmp.lt.s32.totalorder %s1818_s24, 5 }
   0x3   : > { %p1764_p2 = scmp.eq.s32.totalorder %s1243_s28, 0  ;;  %s1820_s29 = smov [#allocation2]  }
   0x4   : > { %p202_p3 = pnand %p1245_p0, %p201_p1  ;;  %s220_s30 = sshll.u32 %s1820_s29, 4  ;;  %s221_s30 = int_to_ptr.vmem [resolvable:$true] %s220_s30 }
   0x5   : > { %s1821_s8 = smov 256   ;;  %s1822_s9 = smov 16  }
   0x6   : > { %p1760_p4 = pneg %p202_p3  ;;  %252 = sbr.rel (%p202_p3) target bundleno = 445 (0x1bd), region = 48 }
   0x8   : > { %p1761_p5 = pnand %p1764_p2, %p1760_p4 }
   0xa   : > { %1763 = dma.hbm_to_vmem [thread:$0]  (!%p1761_p5), %s219_s27, 8192, %s221_s30, [#allocation3], %s1821_s8, %s1821_s8, %s1822_s9  }
   0xb   : > { %1813 = dma.done.wait (%p1764_p2), [#allocation3], 8192  }
   0xc   : > { %1815 = vsyncadd (%p1764_p2), [#allocation3], 4294959104  ;;  %p283_p6 = scmp.lt.s32.totalorder %s1243_s28, 3  ;;  %v1262_v0 = vld [vmem:[%s2022_s1 + $0x10] sm:$0xf]  ;;  %vm324_vm0 = vcmask 261120  }
   0xd   : > { %v1659_v1 = vld [vmem:[%s2022_s1 + $0x14] sm:$0xf0]  ;;  %v1658_v2 = vld [vmem:[%s2022_s1 + $0x14] sm:$0xf]  ;;  %v1264_v4 = vld [vmem:[%s2022_s1 + $0x18] sm:$0xf0] }
   0xe   : > { %s2030_s28 = smov (!%p283_p6, %s1243_s28), 3  ;;  %v1263_v3 = vor.u32 %v1659_v1, %v1262_v0  ;;  %v1254_v5 = vld [vmem:[%s2022_s1] sm:$0xf]  ;;  %v1657_v6 = vld [vmem:[%s2022_s1 + $0x4] sm:$0xf0]  ;;  %v1267_v7 = vor.u32 %v1658_v2, %v1264_v4  ;;  %vm1176_vm1 = vcmask 130048  }
   0xf   : > { %s1250_s10 = sshll.u32 %s2030_s28, 3  ;;  %v1656_v8 = vld [vmem:[%s2022_s1 + $0x4] sm:$0xf]  ;;  %v1256_v9 = vld [vmem:[%s2022_s1 + $0x8] sm:$0xf0]  ;;  %v1255_v11 = vor.u32 %v1657_v6, %v1254_v5 }
  0x10   : > { %s286_s13 = scalar_lea.vmem %s2021_s0, %s1250_s10  ;;  %334 = vmatpush.bf16.msra.mxu0 %v1263_v3  ;;  %v1384_v12 = vld [vmem:[#allocation2 + $0xe0] sm:$0xf]  ;;  %v1690_v13 = vld [vmem:[#allocation2 + $0xec] sm:$0xf0]  ;;  %347 = vmatpush.bf16.msra.mxu1 %v1267_v7  ;;  %v1259_v15 = vor.u32 %v1656_v8, %v1256_v9  ;;  %v1688_v18 = vld [vmem:[#allocation2 + $0xe4] sm:$0xf]  ;;  %s290_s22 = scalar_lea.vmem %s2028_s7, %s1250_s10 }
  0x11   : > { %v292_v10 = vld [vmem:[%s286_s13] sm:$0xff]  ;;  %v1385_v16 = vor.u32 %v1690_v13, %v1384_v12  ;;  %v1722_v17 = vld [vmem:[#allocation2 + $0x1ec] sm:$0xf0]  ;;  %v1386_v19 = vld [vmem:[#allocation2 + $0xf0] sm:$0xf0] }
  0x12   : > { %v1512_v14 = vld [vmem:[#allocation2 + $0x1e0] sm:$0xf]  ;;  %v1389_v21 = vor.u32 %v1688_v18, %v1386_v19  ;;  %v1720_v22 = vld [vmem:[#allocation2 + $0x1e4] sm:$0xf]  ;;  %v1514_v23 = vld [vmem:[#allocation2 + $0x1f0] sm:$0xf0]  ;;  %v293_v25 = vpack.c.bf16 %v292_v10, %v292_v10 }
  0x13   : > { %v1513_v20 = vor.u32 %v1722_v17, %v1512_v14  ;;  %v1368_v24 = vld [vmem:[#allocation2 + $0xc0] sm:$0xf]  ;;  %752 = vmatpush.bf16.msra.mxu2 %v1385_v16  ;;  %v1517_v26 = vor.u32 %v1720_v22, %v1514_v23  ;;  %v1686_v27 = vld [vmem:[#allocation2 + $0xcc] sm:$0xf0]  ;;  %v1684_v32 = vld [vmem:[#allocation2 + $0xc4] sm:$0xf] }
  0x14   : > { %v1496_v28 = vld [vmem:[#allocation2 + $0x1c0] sm:$0xf]  ;;  %v1718_v29 = vld [vmem:[#allocation2 + $0x1cc] sm:$0xf0]  ;;  %335 = vmatpush.bf16.msra.mxu0 %v1255_v11  ;;  %v1369_v30 = vor.u32 %v1686_v27, %v1368_v24  ;;  %v1370_v33 = vld [vmem:[#allocation2 + $0xd0] sm:$0xf0]  ;;  %348 = vmatpush.bf16.msra.mxu1 %v1259_v15 }
  0x15   : > { %765 = vmatpush.bf16.msra.mxu3 %v1513_v20  ;;  %v1497_v31 = vor.u32 %v1718_v29, %v1496_v28  ;;  %v1716_v34 = vld [vmem:[#allocation2 + $0x1c4] sm:$0xf]  ;;  %v1373_v35 = vor.u32 %v1684_v32, %v1370_v33  ;;  %v1498_v36 = vld [vmem:[#allocation2 + $0x1d0] sm:$0xf0]  ;;  %v1352_v37 = vld [vmem:[#allocation2 + $0xa0] sm:$0xf] }
  0x16   : > { %v1682_v38 = vld [vmem:[#allocation2 + $0xac] sm:$0xf0]  ;;  %v1501_v39 = vor.u32 %v1716_v34, %v1498_v36  ;;  %v1480_v40 = vld [vmem:[#allocation2 + $0x1a0] sm:$0xf]  ;;  %v1680_v42 = vld [vmem:[#allocation2 + $0xa4] sm:$0xf] }
  0x17   : > { %v1714_v41 = vld [vmem:[#allocation2 + $0x1ac] sm:$0xf0]  ;;  %1268 = vmatmul.msk.bf16.vlgmr.msra.gmra.mxu0 %vm324_vm0, %v293_v25  ;;  %753 = vmatpush.bf16.msra.mxu2 %v1369_v30  ;;  %v1353_v43 = vor.u32 %v1682_v38, %v1352_v37  ;;  %v1354_v44 = vld [vmem:[#allocation2 + $0xb0] sm:$0xf0]  ;;  %v1712_v45 = vld [vmem:[#allocation2 + $0x1a4] sm:$0xf] }
  0x18   : > { %778 = vmatpush.bf16.msrb.mxu0 %v1389_v21  ;;  %791 = vmatpush.bf16.msrb.mxu1 %v1517_v26  ;;  %v1482_v46 = vld [vmem:[#allocation2 + $0x1b0] sm:$0xf0]  ;;  %v1481_v47 = vor.u32 %v1714_v41, %v1480_v40  ;;  %v1336_v48 = vld [vmem:[#allocation2 + $0x80] sm:$0xf]  ;;  %v1678_v49 = vld [vmem:[#allocation2 + $0x8c] sm:$0xf0]  ;;  %v1357_v50 = vor.u32 %v1680_v42, %v1354_v44 }
  0x19   : > { %1269 = vmatmul.msk.bf16.vlgmr.msra.gmra.mxu1 %vm324_vm0, %v293_v25  ;;  %766 = vmatpush.bf16.msra.mxu3 %v1497_v31  ;;  %v1464_v51 = vld [vmem:[#allocation2 + $0x180] sm:$0xf]  ;;  %v1710_v52 = vld [vmem:[#allocation2 + $0x18c] sm:$0xf0]  ;;  %v1485_v53 = vor.u32 %v1712_v45, %v1482_v46  ;;  %v1676_v54 = vld [vmem:[#allocation2 + $0x84] sm:$0xf]  ;;  %v1337_v56 = vor.u32 %v1678_v49, %v1336_v48 }
  0x1a   : > { %v1338_v55 = vld [vmem:[#allocation2 + $0x90] sm:$0xf0]  ;;  %v1708_v57 = vld [vmem:[#allocation2 + $0x184] sm:$0xf]  ;;  %v1465_v59 = vor.u32 %v1710_v52, %v1464_v51  ;;  %v1320_v60 = vld [vmem:[#allocation2 + $0x60] sm:$0xf] }
  0x1b   : > { %754 = vmatpush.bf16.msra.mxu2 %v1353_v43  ;;  %v1466_v58 = vld [vmem:[#allocation2 + $0x190] sm:$0xf0]  ;;  %v1674_v61 = vld [vmem:[#allocation2 + $0x6c] sm:$0xf0]  ;;  %v1341_v62 = vor.u32 %v1676_v54, %v1338_v55  ;;  %v1448_v63 = vld [vmem:[#allocation2 + $0x160] sm:$0xf] }
  0x1c   : > { %779 = vmatpush.bf16.msrb.mxu0 %v1373_v35  ;;  %792 = vmatpush.bf16.msrb.mxu1 %v1501_v39  ;;  %v1706_v0 = vld [vmem:[#allocation2 + $0x16c] sm:$0xf0]  ;;  %v1469_v1 = vor.u32 %v1708_v57, %v1466_v58  ;;  %v1672_v2 = vld [vmem:[#allocation2 + $0x64] sm:$0xf]  ;;  %v1322_v3 = vld [vmem:[#allocation2 + $0x70] sm:$0xf0]  ;;  %v1321_v4 = vor.u32 %v1674_v61, %v1320_v60 }
  0x1d   : > { %767 = vmatpush.bf16.msra.mxu3 %v1481_v47  ;;  %v1704_v5 = vld [vmem:[#allocation2 + $0x164] sm:$0xf]  ;;  %v1450_v6 = vld [vmem:[#allocation2 + $0x170] sm:$0xf0]  ;;  %v1449_v7 = vor.u32 %v1706_v0, %v1448_v63  ;;  %v1304_v8 = vld [vmem:[#allocation2 + $0x40] sm:$0xf]  ;;  %v1325_v10 = vor.u32 %v1672_v2, %v1322_v3 }
  0x1e   : > { %v1670_v9 = vld [vmem:[#allocation2 + $0x4c] sm:$0xf0]  ;;  %v1432_v11 = vld [vmem:[#allocation2 + $0x140] sm:$0xf]  ;;  %v1453_v13 = vor.u32 %v1704_v5, %v1450_v6  ;;  %v1668_v14 = vld [vmem:[#allocation2 + $0x44] sm:$0xf] }
  0x1f   : > { %755 = vmatpush.bf16.msra.mxu2 %v1337_v56  ;;  %v1702_v12 = vld [vmem:[#allocation2 + $0x14c] sm:$0xf0]  ;;  %v1306_v15 = vld [vmem:[#allocation2 + $0x50] sm:$0xf0]  ;;  %v1305_v16 = vor.u32 %v1670_v9, %v1304_v8  ;;  %v1700_v17 = vld [vmem:[#allocation2 + $0x144] sm:$0xf] }
  0x20   : > { %780 = vmatpush.bf16.msrb.mxu0 %v1357_v50  ;;  %793 = vmatpush.bf16.msrb.mxu1 %v1485_v53  ;;  %v1434_v18 = vld [vmem:[#allocation2 + $0x150] sm:$0xf0]  ;;  %v1433_v19 = vor.u32 %v1702_v12, %v1432_v11  ;;  %v1288_v20 = vld [vmem:[#allocation2 + $0x20] sm:$0xf]  ;;  %v1666_v21 = vld [vmem:[#allocation2 + $0x2c] sm:$0xf0]  ;;  %v1309_v22 = vor.u32 %v1668_v14, %v1306_v15 }
  0x21   : > { %768 = vmatpush.bf16.msra.mxu3 %v1465_v59  ;;  %v1416_v23 = vld [vmem:[#allocation2 + $0x120] sm:$0xf]  ;;  %v1698_v24 = vld [vmem:[#allocation2 + $0x12c] sm:$0xf0]  ;;  %v1664_v25 = vld [vmem:[#allocation2 + $0x24] sm:$0xf]  ;;  %v1437_v26 = vor.u32 %v1700_v17, %v1434_v18  ;;  %v1289_v30 = vor.u32 %v1666_v21, %v1288_v20 }
  0x22   : > { %v1290_v27 = vld [vmem:[#allocation2 + $0x30] sm:$0xf0]  ;;  %v1696_v28 = vld [vmem:[#allocation2 + $0x124] sm:$0xf]  ;;  %v1272_v31 = vld [vmem:[#allocation2] sm:$0xf]  ;;  %v1417_v34 = vor.u32 %v1698_v24, %v1416_v23 }
  0x23   : > { %756 = vmatpush.bf16.msra.mxu2 %v1321_v4  ;;  %v1418_v29 = vld [vmem:[#allocation2 + $0x130] sm:$0xf0]  ;;  %v1662_v32 = vld [vmem:[#allocation2 + $0xc] sm:$0xf0]  ;;  %v1400_v33 = vld [vmem:[#allocation2 + $0x100] sm:$0xf]  ;;  %v1293_v38 = vor.u32 %v1664_v25, %v1290_v27 }
  0x24   : > { %781 = vmatpush.bf16.msrb.mxu0 %v1341_v62  ;;  %794 = vmatpush.bf16.msrb.mxu1 %v1469_v1  ;;  %v1694_v35 = vld [vmem:[#allocation2 + $0x10c] sm:$0xf0]  ;;  %v1660_v36 = vld [vmem:[#allocation2 + $0x4] sm:$0xf]  ;;  %v1274_v37 = vld [vmem:[#allocation2 + $0x10] sm:$0xf0]  ;;  %v1421_v42 = vor.u32 %v1696_v28, %v1418_v29  ;;  %v1273_v46 = vor.u32 %v1662_v32, %v1272_v31 }
  0x25   : > { %769 = vmatpush.bf16.msra.mxu3 %v1449_v7  ;;  %v1692_v39 = vld [vmem:[#allocation2 + $0x104] sm:$0xf]  ;;  %v1392_v40 = vld [vmem:[#allocation2 + $0xe8] sm:$0xf]  ;;  %v1691_v41 = vld [vmem:[#allocation2 + $0xf4] sm:$0xf0]  ;;  %v1401_v49 = vor.u32 %v1694_v35, %v1400_v33  ;;  %v1277_v53 = vor.u32 %v1660_v36, %v1274_v37 }
  0x26   : > { %v1402_v43 = vld [vmem:[#allocation2 + $0x110] sm:$0xf0]  ;;  %v1520_v44 = vld [vmem:[#allocation2 + $0x1e8] sm:$0xf]  ;;  %v1723_v45 = vld [vmem:[#allocation2 + $0x1f4] sm:$0xf0]  ;;  %v1393_v50 = vor.u32 %v1691_v41, %v1392_v40 }
  0x27   : > { %757 = vmatpush.bf16.msra.mxu2 %v1305_v16  ;;  %v1689_v47 = vld [vmem:[#allocation2 + $0xec] sm:$0xf]  ;;  %v1394_v48 = vld [vmem:[#allocation2 + $0xf8] sm:$0xf0]  ;;  %v1521_v54 = vor.u32 %v1723_v45, %v1520_v44  ;;  %v1376_v55 = vld [vmem:[#allocation2 + $0xc8] sm:$0xf]  ;;  %v1405_v57 = vor.u32 %v1692_v39, %v1402_v43 }
  0x28   : > { %782 = vmatpush.bf16.msrb.mxu0 %v1325_v10  ;;  %795 = vmatpush.bf16.msrb.mxu1 %v1453_v13  ;;  %v1721_v51 = vld [vmem:[#allocation2 + $0x1ec] sm:$0xf]  ;;  %v1522_v52 = vld [vmem:[#allocation2 + $0x1f8] sm:$0xf0]  ;;  %v1687_v56 = vld [vmem:[#allocation2 + $0xd4] sm:$0xf0]  ;;  %v1397_v58 = vor.u32 %v1689_v47, %v1394_v48 }
  0x29   : > { %770 = vmatpush.bf16.msra.mxu3 %v1433_v19  ;;  %v1504_v59 = vld [vmem:[#allocation2 + $0x1c8] sm:$0xf]  ;;  %v1719_v60 = vld [vmem:[#allocation2 + $0x1d4] sm:$0xf0]  ;;  %v1525_v61 = vor.u32 %v1721_v51, %v1522_v52  ;;  %v1685_v62 = vld [vmem:[#allocation2 + $0xcc] sm:$0xf]  ;;  %v1377_v0 = vor.u32 %v1687_v56, %v1376_v55 }
  0x2a   : > { %v1378_v63 = vld [vmem:[#allocation2 + $0xd8] sm:$0xf0]  ;;  %v1717_v1 = vld [vmem:[#allocation2 + $0x1cc] sm:$0xf]  ;;  %v1505_v3 = vor.u32 %v1719_v60, %v1504_v59  ;;  %v1360_v6 = vld [vmem:[#allocation2 + $0xa8] sm:$0xf] }
  0x2b   : > { %758 = vmatpush.bf16.msra.mxu2 %v1289_v30  ;;  %v1506_v2 = vld [vmem:[#allocation2 + $0x1d8] sm:$0xf0]  ;;  %v1381_v4 = vor.u32 %v1685_v62, %v1378_v63  ;;  %v1683_v7 = vld [vmem:[#allocation2 + $0xb4] sm:$0xf0]  ;;  %v1488_v8 = vld [vmem:[#allocation2 + $0x1a8] sm:$0xf] }
  0x2c   : > { %783 = vmatpush.bf16.msrb.mxu0 %v1309_v22  ;;  %796 = vmatpush.bf16.msrb.mxu1 %v1437_v26  ;;  %v1509_v5 = vor.u32 %v1717_v1, %v1506_v2  ;;  %v1361_v9 = vor.u32 %v1683_v7, %v1360_v6  ;;  %v1715_v10 = vld [vmem:[#allocation2 + $0x1b4] sm:$0xf0]  ;;  %v1681_v11 = vld [vmem:[#allocation2 + $0xac] sm:$0xf]  ;;  %v1362_v12 = vld [vmem:[#allocation2 + $0xb8] sm:$0xf0] }
  0x2d   : > { %771 = vmatpush.bf16.msra.mxu3 %v1417_v34  ;;  %v1489_v13 = vor.u32 %v1715_v10, %v1488_v8  ;;  %v1365_v14 = vor.u32 %v1681_v11, %v1362_v12  ;;  %v1713_v15 = vld [vmem:[#allocation2 + $0x1ac] sm:$0xf]  ;;  %v1490_v16 = vld [vmem:[#allocation2 + $0x1b8] sm:$0xf0]  ;;  %v1344_v18 = vld [vmem:[#allocation2 + $0x88] sm:$0xf] }
  0x2e   : > { %v1493_v17 = vor.u32 %v1713_v15, %v1490_v16  ;;  %v1679_v19 = vld [vmem:[#allocation2 + $0x94] sm:$0xf0]  ;;  %v1472_v20 = vld [vmem:[#allocation2 + $0x188] sm:$0xf]  ;;  %v1677_v23 = vld [vmem:[#allocation2 + $0x8c] sm:$0xf] }
  0x2f   : > { %759 = vmatpush.bf16.msra.mxu2 %v1273_v46  ;;  %v1345_v21 = vor.u32 %v1679_v19, %v1344_v18  ;;  %v1711_v22 = vld [vmem:[#allocation2 + $0x194] sm:$0xf0]  ;;  %v1346_v24 = vld [vmem:[#allocation2 + $0x98] sm:$0xf0]  ;;  %v1709_v27 = vld [vmem:[#allocation2 + $0x18c] sm:$0xf] }
  0x30   : > { %784 = vmatpush.bf16.msrb.mxu0 %v1293_v38  ;;  %797 = vmatpush.bf16.msrb.mxu1 %v1421_v42  ;;  %v1473_v25 = vor.u32 %v1711_v22, %v1472_v20  ;;  %v1349_v26 = vor.u32 %v1677_v23, %v1346_v24  ;;  %v1474_v28 = vld [vmem:[#allocation2 + $0x198] sm:$0xf0]  ;;  %v1328_v30 = vld [vmem:[#allocation2 + $0x68] sm:$0xf]  ;;  %v1675_v31 = vld [vmem:[#allocation2 + $0x74] sm:$0xf0] }
  0x31   : > { %772 = vmatpush.bf16.msra.mxu3 %v1401_v49  ;;  %v1477_v29 = vor.u32 %v1709_v27, %v1474_v28  ;;  %v1456_v32 = vld [vmem:[#allocation2 + $0x168] sm:$0xf]  ;;  %v1329_v33 = vor.u32 %v1675_v31, %v1328_v30  ;;  %v1707_v34 = vld [vmem:[#allocation2 + $0x174] sm:$0xf0]  ;;  %v1673_v35 = vld [vmem:[#allocation2 + $0x6c] sm:$0xf] }
  0x32   : > { %v1330_v36 = vld [vmem:[#allocation2 + $0x78] sm:$0xf0]  ;;  %v1457_v37 = vor.u32 %v1707_v34, %v1456_v32  ;;  %v1705_v39 = vld [vmem:[#allocation2 + $0x16c] sm:$0xf]  ;;  %v1312_v42 = vld [vmem:[#allocation2 + $0x48] sm:$0xf] }
  0x33   : > { %804 = vmatpush.bf16.msrb.mxu2 %v1393_v50  ;;  %v1333_v38 = vor.u32 %v1673_v35, %v1330_v36  ;;  %v1458_v40 = vld [vmem:[#allocation2 + $0x178] sm:$0xf0]  ;;  %v1671_v43 = vld [vmem:[#allocation2 + $0x54] sm:$0xf0]  ;;  %v1440_v44 = vld [vmem:[#allocation2 + $0x148] sm:$0xf] }
  0x34   : > { %785 = vmatpush.bf16.msrb.mxu0 %v1277_v53  ;;  %798 = vmatpush.bf16.msrb.mxu1 %v1405_v57  ;;  %v1461_v41 = vor.u32 %v1705_v39, %v1458_v40  ;;  %v1313_v45 = vor.u32 %v1671_v43, %v1312_v42  ;;  %v1703_v46 = vld [vmem:[#allocation2 + $0x154] sm:$0xf0]  ;;  %v1669_v47 = vld [vmem:[#allocation2 + $0x4c] sm:$0xf]  ;;  %v1314_v48 = vld [vmem:[#allocation2 + $0x58] sm:$0xf0] }
  0x35   : > { %817 = vmatpush.bf16.msrb.mxu3 %v1521_v54  ;;  %v1441_v49 = vor.u32 %v1703_v46, %v1440_v44  ;;  %v1317_v50 = vor.u32 %v1669_v47, %v1314_v48  ;;  %v1701_v51 = vld [vmem:[#allocation2 + $0x14c] sm:$0xf]  ;;  %v1442_v52 = vld [vmem:[#allocation2 + $0x158] sm:$0xf0]  ;;  %v1296_v53 = vld [vmem:[#allocation2 + $0x28] sm:$0xf] }
  0x36   : > { %v1445_v54 = vor.u32 %v1701_v51, %v1442_v52  ;;  %v1667_v55 = vld [vmem:[#allocation2 + $0x34] sm:$0xf0]  ;;  %v1424_v56 = vld [vmem:[#allocation2 + $0x128] sm:$0xf]  ;;  %v1665_v59 = vld [vmem:[#allocation2 + $0x2c] sm:$0xf] }
  0x37   : > { %805 = vmatpush.bf16.msrb.mxu2 %v1377_v0  ;;  %v1699_v57 = vld [vmem:[#allocation2 + $0x134] sm:$0xf0]  ;;  %v1298_v60 = vld [vmem:[#allocation2 + $0x38] sm:$0xf0]  ;;  %v1280_v1 = vld [vmem:[#allocation2 + $0x8] sm:$0xf] }
  0x38   : > { %830 = vmatpush.bf16.msra.mxu0 %v1397_v58  ;;  %843 = vmatpush.bf16.msra.mxu1 %v1525_v61  ;;  %v1297_v58 = vor.u32 %v1667_v55, %v1296_v53  ;;  %v1697_v61 = vld [vmem:[#allocation2 + $0x12c] sm:$0xf]  ;;  %v1425_v62 = vor.u32 %v1699_v57, %v1424_v56  ;;  %v1301_v63 = vor.u32 %v1665_v59, %v1298_v60  ;;  %v1426_v0 = vld [vmem:[#allocation2 + $0x138] sm:$0xf0]  ;;  %v1663_v2 = vld [vmem:[#allocation2 + $0x14] sm:$0xf0] }
  0x39   : > { %818 = vmatpush.bf16.msrb.mxu3 %v1505_v3  ;;  %v1429_v3 = vor.u32 %v1697_v61, %v1426_v0  ;;  %v1661_v6 = vld [vmem:[#allocation2 + $0xc] sm:$0xf]  ;;  %v1282_v7 = vld [vmem:[#allocation2 + $0x18] sm:$0xf0]  ;;  %v1281_v10 = vor.u32 %v1663_v2, %v1280_v1  ;;  %v1738_v30 = vld [vmem:[%s2026_s5 + $0x70] sm:$0xff] }
  0x3a   : > { %v1693_v8 = vld [vmem:[#allocation2 + $0x10c] sm:$0xf]  ;;  %v1285_v12 = vor.u32 %v1661_v6, %v1282_v7  ;;  %v1739_v24 = vld [vmem:[%s2026_s5 + $0x78] sm:$0xff]  ;;  %v1730_v31 = vld [vmem:[%s2026_s5 + $0x30] sm:$0xff] }
  0x3b   : > { %806 = vmatpush.bf16.msrb.mxu2 %v1361_v9  ;;  %v1410_v9 = vld [vmem:[#allocation2 + $0x118] sm:$0xf0]  ;;  %v1754_v32 = vld [vmem:[%s2026_s5 + $0xf0] sm:$0xff]  ;;  %v1729_v34 = vld [vmem:[%s2026_s5 + $0x28] sm:$0xff] }
  0x3c   : > { %831 = vmatpush.bf16.msra.mxu0 %v1381_v4  ;;  %844 = vmatpush.bf16.msra.mxu1 %v1509_v5  ;;  %v1408_v4 = vld [vmem:[#allocation2 + $0x108] sm:$0xf]  ;;  %v1695_v5 = vld [vmem:[#allocation2 + $0x114] sm:$0xf0]  ;;  %v1736_v35 = vld [vmem:[%s2026_s5 + $0x60] sm:$0xff] }
  0x3d   : > { %819 = vmatpush.bf16.msrb.mxu3 %v1489_v13  ;;  %v1409_v11 = vor.u32 %v1695_v5, %v1408_v4  ;;  %v1413_v13 = vor.u32 %v1693_v8, %v1410_v9  ;;  %v1755_v27 = vld [vmem:[%s2026_s5 + $0xf8] sm:$0xff]  ;;  %v1728_v36 = vld [vmem:[%s2026_s5 + $0x20] sm:$0xff]  ;;  %v1753_v42 = vld [vmem:[%s2026_s5 + $0xe8] sm:$0xff] }
  0x3e   : > { %v1727_v39 = vld [vmem:[%s2026_s5 + $0x18] sm:$0xff]  ;;  %v1726_v43 = vld [vmem:[%s2026_s5 + $0x10] sm:$0xff]  ;;  %v1752_v46 = vld [vmem:[%s2026_s5 + $0xe0] sm:$0xff] }
  0x3f   : > { %807 = vmatpush.bf16.msrb.mxu2 %v1345_v21  ;;  %v1747_v40 = vld [vmem:[%s2026_s5 + $0xb8] sm:$0xff]  ;;  %v1746_v44 = vld [vmem:[%s2026_s5 + $0xb0] sm:$0xff]  ;;  %v1725_v47 = vld [vmem:[%s2026_s5 + $0x8] sm:$0xff] }
  0x40   : > { %832 = vmatpush.bf16.msra.mxu0 %v1365_v14  ;;  %845 = vmatpush.bf16.msra.mxu1 %v1493_v17  ;;  %v298_v14 = vld [vmem:[%s2023_s2] sm:$0x3]  ;;  %v1745_v48 = vld [vmem:[%s2026_s5 + $0xa8] sm:$0xff]  ;;  %v1750_v52 = vld [vmem:[%s2026_s5 + $0xd0] sm:$0xff] }
  0x41   : > { %820 = vmatpush.bf16.msrb.mxu3 %v1473_v25  ;;  %v300_v15 = vperm.slane %v298_v14, 0  ;;  %v301_v16 = vperm.slane %v298_v14, 1  ;;  %v1731_v25 = vld [vmem:[%s2026_s5 + $0x38] sm:$0xff]  ;;  %v1744_v51 = vld [vmem:[%s2026_s5 + $0xa0] sm:$0xff]  ;;  %v1742_v55 = vld [vmem:[%s2026_s5 + $0x90] sm:$0xff] }
  0x42   : > { %v1743_v53 = vld [vmem:[%s2026_s5 + $0x98] sm:$0xff]  ;;  %v1748_v56 = vld [vmem:[%s2026_s5 + $0xc0] sm:$0xff]  ;;  %v1741_v57 = vld [vmem:[%s2026_s5 + $0x88] sm:$0xff] }
  0x43   : > { %808 = vmatpush.bf16.msrb.mxu2 %v1329_v33  ;;  %v1737_v33 = vld [vmem:[%s2026_s5 + $0x68] sm:$0xff]  ;;  %v1740_v59 = vld [vmem:[%s2026_s5 + $0x80] sm:$0xff] }
  0x44   : > { %833 = vmatpush.bf16.msra.mxu0 %v1349_v26  ;;  %846 = vmatpush.bf16.msra.mxu1 %v1477_v29 }
  0x45   : > { %821 = vmatpush.bf16.msrb.mxu3 %v1457_v37  ;;  %v1735_v37 = vld [vmem:[%s2026_s5 + $0x58] sm:$0xff] }
  0x47   : > { %809 = vmatpush.bf16.msrb.mxu2 %v1313_v45  ;;  %v1732_v45 = vld [vmem:[%s2026_s5 + $0x40] sm:$0xff] }
  0x48   : > { %834 = vmatpush.bf16.msra.mxu0 %v1333_v38  ;;  %847 = vmatpush.bf16.msra.mxu1 %v1461_v41  ;;  %v1734_v38 = vld [vmem:[%s2026_s5 + $0x50] sm:$0xff]  ;;  %v1733_v41 = vld [vmem:[%s2026_s5 + $0x48] sm:$0xff] }
  0x49   : > { %822 = vmatpush.bf16.msrb.mxu3 %v1441_v49  ;;  %v1751_v49 = vld [vmem:[%s2026_s5 + $0xd8] sm:$0xff] }
  0x4b   : > { %810 = vmatpush.bf16.msrb.mxu2 %v1297_v58  ;;  %v422_v58 = vld [vmem:[%s2025_s4] sm:$0xf] }
  0x4c   : > { %835 = vmatpush.bf16.msra.mxu0 %v1317_v50  ;;  %848 = vmatpush.bf16.msra.mxu1 %v1445_v54  ;;  %v1724_v50 = vld [vmem:[%s2026_s5] sm:$0xff]  ;;  %v1749_v54 = vld [vmem:[%s2026_s5 + $0xc8] sm:$0xff]  ;;  %v425_v60 = vperm.slane %v422_v58, 1  ;;  %v424_v1 = vperm.slane %v422_v58, 0 }
  0x4d   : > { %823 = vmatpush.bf16.msrb.mxu3 %v1425_v62 }
  0x4f   : > { %811 = vmatpush.bf16.msrb.mxu2 %v1281_v10 }
  0x50   : > { %836 = vmatpush.bf16.msra.mxu0 %v1301_v63  ;;  %849 = vmatpush.bf16.msra.mxu1 %v1429_v3 }
  0x51   : > { %824 = vmatpush.bf16.msrb.mxu3 %v1409_v11 }
  0x54   : > { %837 = vmatpush.bf16.msra.mxu0 %v1285_v12  ;;  %850 = vmatpush.bf16.msra.mxu1 %v1413_v13  ;;  %v427_v12 = vperm.slane %v422_v58, 3 }
  0x94   : > { %v337_v17 = vpop.f32.mrf.mxu0 }
  0x95   : > { %v338_v18 = vadd.f32 %v337_v17, %v300_v15 }
  0x96   : > { %v350_v19 = vpop.f32.mrf.mxu1 }
  0x97   : > { %v351_v20 = vadd.f32 %v350_v19, %v301_v16  ;;  %v354_v21 = vmax.f32 %v338_v18, 0.0  ;;  %v426_v19 = vperm.slane %v422_v58, 2 }
  0x99   : > { %v355_v22 = vmax.f32 %v351_v20, 0.0  ;;  %v356_v23 = vpack.c.bf16 %v354_v21, %v354_v21 }
  0x9b   : > { %v357_v26 = vpack.c.bf16 %v355_v22, %v355_v22  ;;  %760 = vmatmul.bf16.vlgmr.msra.gmra.mxu2 %v356_v23  ;;  %786 = vmatmul.bf16.vlgmr.msrb.gmra.mxu0 %v356_v23 }
  0x9c   : > { %v339_v28 = vpop.f32.mrf.mxu0  ;;  %1124 = vmatpush.bf16.msra.mxu2 %v1731_v25  ;;  %1150 = vmatpush.bf16.msrb.mxu0 %v1747_v40 }
  0x9d   : > { %773 = vmatmul.bf16.vlgmr.msra.gmra.mxu3 %v357_v26  ;;  %799 = vmatmul.bf16.vlgmr.msrb.gmra.mxu1 %v357_v26 }
  0x9e   : > { %v352_v29 = vpop.f32.mrf.mxu1  ;;  %1137 = vmatpush.bf16.msra.mxu3 %v1739_v24  ;;  %1163 = vmatpush.bf16.msrb.mxu1 %v1755_v27 }
  0xa0   : > { %1125 = vmatpush.bf16.msra.mxu2 %v1730_v31  ;;  %1151 = vmatpush.bf16.msrb.mxu0 %v1746_v44 }
  0xa2   : > { %1138 = vmatpush.bf16.msra.mxu3 %v1738_v30  ;;  %1164 = vmatpush.bf16.msrb.mxu1 %v1754_v32 }
  0xa4   : > { %1126 = vmatpush.bf16.msra.mxu2 %v1729_v34  ;;  %1152 = vmatpush.bf16.msrb.mxu0 %v1745_v48  ;;  %v1777_v34 = vld [vmem:[%s2027_s6] ss:$0 sm:$0xff] }
  0xa6   : > { %1139 = vmatpush.bf16.msra.mxu3 %v1737_v33  ;;  %1165 = vmatpush.bf16.msrb.mxu1 %v1753_v42 }
  0xa8   : > { %1127 = vmatpush.bf16.msra.mxu2 %v1728_v36  ;;  %1153 = vmatpush.bf16.msrb.mxu0 %v1744_v51 }
  0xaa   : > { %1140 = vmatpush.bf16.msra.mxu3 %v1736_v35  ;;  %1166 = vmatpush.bf16.msrb.mxu1 %v1752_v46 }
  0xab   : > { %812 = vmatmul.bf16.vlgmr.msrb.gmra.mxu2 %v356_v23  ;;  %838 = vmatmul.bf16.vlgmr.msra.gmra.mxu0 %v356_v23 }
  0xac   : > { %1128 = vmatpush.bf16.msra.mxu2 %v1727_v39  ;;  %1154 = vmatpush.bf16.msrb.mxu0 %v1743_v53 }
  0xad   : > { %825 = vmatmul.bf16.vlgmr.msrb.gmra.mxu3 %v357_v26  ;;  %851 = vmatmul.bf16.vlgmr.msra.gmra.mxu1 %v357_v26 }
  0xae   : > { %1141 = vmatpush.bf16.msra.mxu3 %v1735_v37  ;;  %1167 = vmatpush.bf16.msrb.mxu1 %v1751_v49 }
  0xb0   : > { %1129 = vmatpush.bf16.msra.mxu2 %v1726_v43  ;;  %1155 = vmatpush.bf16.msrb.mxu0 %v1742_v55 }
  0xb2   : > { %1142 = vmatpush.bf16.msra.mxu3 %v1734_v38  ;;  %1168 = vmatpush.bf16.msrb.mxu1 %v1750_v52 }
  0xb4   : > { %1130 = vmatpush.bf16.msra.mxu2 %v1725_v47  ;;  %1156 = vmatpush.bf16.msrb.mxu0 %v1741_v57 }
  0xb6   : > { %1143 = vmatpush.bf16.msra.mxu3 %v1733_v41  ;;  %1169 = vmatpush.bf16.msrb.mxu1 %v1749_v54 }
  0xb8   : > { %1131 = vmatpush.bf16.msra.mxu2 %v1724_v50  ;;  %1157 = vmatpush.bf16.msrb.mxu0 %v1740_v59 }
  0xba   : > { %1144 = vmatpush.bf16.msra.mxu3 %v1732_v45  ;;  %1170 = vmatpush.bf16.msrb.mxu1 %v1748_v56 }
 0x118   : > { %v787_v61 = vpop.f32.mrf.mxu0 }
 0x119   : > { %v788_v62 = vadd.f32 %v787_v61, %v425_v60 }
 0x11a   : > { %v800_v63 = vpop.f32.mrf.mxu1 }
 0x11b   : > { %v801_v0 = vadd.f32 %v800_v63, %v788_v62 }
 0x11d   : > { %v857_v2 = vmax.f32 %v801_v0, 0.0 }
 0x11e   : > { %v761_v3 = vpop.f32.mrf.mxu2 }
 0x11f   : > { %v861_v4 = vpack.c.bf16 %v857_v2, %v857_v2  ;;  %v762_v5 = vadd.f32 %v761_v3, %v424_v1 }
 0x120   : > { %v774_v6 = vpop.f32.mrf.mxu3  ;;  %v789_v7 = vpop.f32.mrf.mxu0 }
 0x121   : > { %v775_v8 = vadd.f32 %v774_v6, %v762_v5  ;;  %1145 = vmatmul.bf16.vlgmr.msra.gmra.mxu3 %v861_v4 }
 0x122   : > { %v802_v9 = vpop.f32.mrf.mxu1 }
 0x123   : > { %v856_v10 = vmax.f32 %v775_v8, 0.0 }
 0x125   : > { %v860_v11 = vpack.c.bf16 %v856_v10, %v856_v10 }
 0x126   : > { %v763_v13 = vpop.f32.mrf.mxu2 }
 0x127   : > { %1132 = vmatmul.bf16.vlgmr.msra.gmra.mxu2 %v860_v11 }
 0x128   : > { %v776_v14 = vpop.f32.mrf.mxu3  ;;  %v839_v15 = vpop.f32.mrf.mxu0 }
 0x129   : > { %v840_v16 = vadd.f32 %v839_v15, %v427_v12 }
 0x12a   : > { %v852_v17 = vpop.f32.mrf.mxu1 }
 0x12b   : > { %v853_v18 = vadd.f32 %v852_v17, %v840_v16 }
 0x12d   : > { %v859_v20 = vmax.f32 %v853_v18, 0.0 }
 0x12e   : > { %v813_v21 = vpop.f32.mrf.mxu2 }
 0x12f   : > { %v863_v22 = vpack.c.bf16 %v859_v20, %v859_v20  ;;  %v814_v23 = vadd.f32 %v813_v21, %v426_v19 }
 0x130   : > { %v826_v24 = vpop.f32.mrf.mxu3  ;;  %v841_v25 = vpop.f32.mrf.mxu0 }
 0x131   : > { %v827_v26 = vadd.f32 %v826_v24, %v814_v23  ;;  %1171 = vmatmul.bf16.vlgmr.msrb.gmra.mxu1 %v863_v22 }
 0x132   : > { %v854_v27 = vpop.f32.mrf.mxu1 }
 0x133   : > { %v858_v28 = vmax.f32 %v827_v26, 0.0 }
 0x135   : > { %v862_v29 = vpack.c.bf16 %v858_v28, %v858_v28 }
 0x136   : > { %v815_v30 = vpop.f32.mrf.mxu2 }
 0x137   : > { %1158 = vmatmul.bf16.vlgmr.msrb.gmra.mxu0 %v862_v29 }
 0x138   : > { %v828_v31 = vpop.f32.mrf.mxu3 }
 0x1a4   : > { %v1146_v32 = vpop.f32.mrf.mxu3 }
 0x1aa   : > { %v1133_v33 = vpop.f32.mrf.mxu2 }
 0x1ab   : > { %v1134_v37 = vadd.f32 %v1777_v34, %v1133_v33 }
 0x1ac   : > { %v1148_v35 = vpop.f32.mrf.mxu3 }
 0x1ad   : > { %v1147_v39 = vadd.f32 %v1146_v32, %v1134_v37 }
 0x1ae   : > { %v1172_v36 = vpop.f32.mrf.mxu1 }
 0x1b2   : > { %v1135_v38 = vpop.f32.mrf.mxu2 }
 0x1b4   : > { %v1159_v40 = vpop.f32.mrf.mxu0 }
 0x1b5   : > { %v1160_v41 = vadd.f32 %v1159_v40, %v1147_v39 }
 0x1b6   : > { %v1174_v42 = vpop.f32.mrf.mxu1 }
 0x1b7   : > { %v1173_v43 = vadd.f32 %v1172_v36, %v1160_v41 }
 0x1b9   : > { %1177 = vst.msk [vmem:[%s290_s22] sm:$0xff] %vm1176_vm1, %v1173_v43 }
 0x1bc   : > { %v1161_v44 = vpop.f32.mrf.mxu0 }
 0x1bd PF: > { %s18_s24 = sadd.s32 1, %s1818_s24  }
 0x1be   : > { %p15_p7 = scmp.ge.s32.totalorder %s18_s24, 6  }
 0x1c0   :  { %17 = sbr.rel (!%p15_p7) target bundleno = 1 (0x1), region = 83 }
 0x1c5   :  { %1197 = vsyncpa [#allocation3], 1 }
 0x1c6   :  { %1199 = vsyncpa [#allocation3 + $0x1], 1 }

</bundles_post_ra>
